<compile_context>
chip_gen: v7x
topology: tpu7x:2x2x1
jax: 0.10.0
libtpu: 0.0.40
codegen_flags: <defaults>
</compile_context>

<pallas_src>
import math

import jax
import jax.numpy as jnp
from jax.experimental import pallas as pl
from jax.experimental.pallas import tpu as pltpu


def _make_bessel_kernel(num_bases: int, omega: float, prefactor: float):
    """Build a kernel with compile-time-constant omega/prefactor baked in."""

    def kernel(x_ref, o_ref):
        # x_ref: (TILE_R, 128)              edge distances, fully packed
        # o_ref: (num_bases, TILE_R, 128)   one full-width slab per basis
        x = x_ref[...]
        theta = omega * x

        # approx reciprocal on the EUP slot + one Newton step (2 VALU ops) to restore
        # full f32 precision; fold in the prefactor.
        # (x == 0 gives inf/nan, matching the PyTorch module.)
        inv = pl.reciprocal(x, approx=True)
        inv = inv * (2.0 - x * inv)
        scale = prefactor * inv

        # sin(k * theta), k = 1..num_bases, via the 3-term recurrence
        #   sin((k+1)t) = 2*cos(t)*sin(k*t) - sin((k-1)t)
        # NOTE: error grows slowly with k; fine for num_bases ~ 8, revalidate if the
        # basis count is ever made large (> ~64).
        s1 = jnp.sin(theta)
        o_ref[0] = s1 * scale
        if num_bases >= 2:
            c2 = 2.0 * jnp.cos(theta)
            s_prev, s_cur = s1, c2 * s1  # sin(2*theta) = 2*cos(theta)*sin(theta)
            o_ref[1] = s_cur * scale
            for k in range(2, num_bases):
                s_prev, s_cur = s_cur, c2 * s_cur - s_prev
                o_ref[k] = s_cur * scale

    return kernel


def bessel_basis_t(x, r_max: float, num_bases: int = 8, *, tile_rows: int = 512):
    """BesselBasis.forward in transposed, lane-dense layout.

    x: [N] float -> [num_bases, N] float32.  Prefer this layout downstream (fold the
    transpose into the consumer, e.g. as W @ out); see `bessel_basis` for the
    PyTorch-layout compatibility wrapper.
    """
    # TODO(synk): trainable bessel_weights would need the general sin(w * x) path
    # (the integer-multiple recurrence assumes weights = k * pi / r_max).
    n = x.shape[0]
    omega = math.pi / r_max
    prefactor = math.sqrt(2.0 / r_max)

    lanes = 128
    tile_rows = max(8, (tile_rows // 8) * 8)          # sublane multiple
    rows = pl.cdiv(n, lanes)
    tile_r = min(tile_rows, pl.cdiv(rows, 8) * 8)     # shrink for small inputs
    rows_pad = pl.cdiv(rows, tile_r) * tile_r
    n_pad = rows_pad * lanes

    # Pad N up to a whole number of (tile_r, 128) blocks; pad value 1.0 keeps dead
    # lanes finite.  Edge axis lives on (sublane, lane) -> fully packed vregs.
    x_pack = jnp.pad(x.astype(jnp.float32), (0, n_pad - n), constant_values=1.0)
    x_pack = x_pack.reshape(rows_pad, lanes)

    out = pl.pallas_call(
        _make_bessel_kernel(num_bases, omega, prefactor),
        out_shape=jax.ShapeDtypeStruct((num_bases, rows_pad, lanes), jnp.float32),
        grid=(rows_pad // tile_r,),
        in_specs=[pl.BlockSpec((tile_r, lanes), lambda i: (i, 0))],
        out_specs=pl.BlockSpec((num_bases, tile_r, lanes), lambda i: (0, i, 0)),
        compiler_params=pltpu.CompilerParams(
            dimension_semantics=("parallel",),
        ),
    )(x_pack)

    # (num_bases, rows_pad, 128) -> (num_bases, n_pad) is a contiguous (free) reshape.
    return out.reshape(num_bases, n_pad)[:, :n]


def bessel_basis(x, r_max: float, num_bases: int = 8, *, tile_rows: int = 512):
    """PyTorch-layout compatibility wrapper: [N] -> [N, num_bases].

    The transpose re-reads/re-writes the whole output; in a real pipeline keep the
    [num_bases, N] layout from `bessel_basis_t` and fold the transpose into the
    consumer instead.
    """
    return bessel_basis_t(x, r_max, num_bases, tile_rows=tile_rows).T


if __name__ == "__main__":
    r_max = 6.0
    num_bases = 8
    n_edges = 200  # not a multiple of 128 -> exercises padding / partial last lanes

    # Deterministic positive edge distances (avoid x == 0, as for real edge lengths).
    key = jax.random.PRNGKey(0)
    x = jax.random.uniform(key, (n_edges,), dtype=jnp.float32, minval=0.5, maxval=r_max)

    out_t = jax.block_until_ready(bessel_basis_t(x, r_max, num_bases))   # [num_bases, N]
    out = jax.block_until_ready(bessel_basis(x, r_max, num_bases))       # [N, num_bases]

    # Pure-JAX reference of the PyTorch forward semantics.
    bessel_weights = (math.pi / r_max) * jnp.linspace(
        1.0, float(num_bases), num_bases, dtype=jnp.float32
    )
    prefactor = math.sqrt(2.0 / r_max)
    ref = prefactor * jnp.sin(bessel_weights[None, :] * x[:, None]) / x[:, None]

    assert out_t.shape == (num_bases, n_edges)
    assert out.shape == (n_edges, num_bases)
    assert out.dtype == jnp.float32
    err_t = float(jnp.max(jnp.abs(out_t - ref.T)))
    err = float(jnp.max(jnp.abs(out - ref)))
    assert jnp.allclose(out_t, ref.T, rtol=1e-5, atol=1e-5), err_t
    assert jnp.allclose(out, ref, rtol=1e-5, atol=1e-5), err

    print("KERNEL_OK")
</pallas_src>

<mosaic_0001>
module attributes {stable_mosaic.version = 11 : i64} {
  func.func @kernel(%arg0: i32, %arg1: memref<8x128xf32, #tpu.memory_space<vmem>>, %arg2: memref<8x8x128xf32, #tpu.memory_space<vmem>>) attributes {dimension_semantics = [#tpu.dimension_semantics<parallel>], iteration_bounds = array<i64: 1>, scalar_prefetch = 0 : i64, scratch_operands = 0 : i64, tpu.core_type = #tpu.core_type<tc>, window_params = [{transform_indices = @transform_0, window_bounds = array<i64: 8, 128>}, {transform_indices = @transform_1, window_bounds = array<i64: 8, 8, 128>}]} {
    %c0 = arith.constant 0 : index
    %c0_0 = arith.constant 0 : index
    %0 = vector.load %arg1[%c0, %c0_0] : memref<8x128xf32, #tpu.memory_space<vmem>>, vector<8x128xf32>
    %cst = arith.constant 0.52359879 : f32
    %1 = vector.broadcast %cst : f32 to vector<8x128xf32>
    %2 = arith.mulf %1, %0 : vector<8x128xf32>
    %3 = tpu.reciprocal %0 {approx = true} : vector<8x128xf32> -> vector<8x128xf32>
    %4 = arith.mulf %0, %3 : vector<8x128xf32>
    %cst_1 = arith.constant 2.000000e+00 : f32
    %5 = vector.broadcast %cst_1 : f32 to vector<8x128xf32>
    %6 = arith.subf %5, %4 : vector<8x128xf32>
    %7 = arith.mulf %3, %6 : vector<8x128xf32>
    %cst_2 = arith.constant 0.577350259 : f32
    %8 = vector.broadcast %cst_2 : f32 to vector<8x128xf32>
    %9 = arith.mulf %8, %7 : vector<8x128xf32>
    %10 = math.sin %2 : vector<8x128xf32>
    %11 = arith.mulf %10, %9 : vector<8x128xf32>
    %c0_3 = arith.constant 0 : index
    %c0_4 = arith.constant 0 : index
    %c0_5 = arith.constant 0 : index
    %12 = vector.load %arg2[%c0_3, %c0_4, %c0_5] : memref<8x8x128xf32, #tpu.memory_space<vmem>>, vector<1x8x128xf32>
    %13 = vector.shape_cast %12 : vector<1x8x128xf32> to vector<8x128xf32>
    %14 = vector.shape_cast %11 : vector<8x128xf32> to vector<1x8x128xf32>
    tpu.vector_store %arg2[%c0_3, %c0_4, %c0_5], %14 {strides = array<i32>} : memref<8x8x128xf32, #tpu.memory_space<vmem>>, vector<1x8x128xf32>,
    %15 = math.cos %2 : vector<8x128xf32>
    %cst_6 = arith.constant 2.000000e+00 : f32
    %16 = vector.broadcast %cst_6 : f32 to vector<8x128xf32>
    %17 = arith.mulf %16, %15 : vector<8x128xf32>
    %18 = arith.mulf %17, %10 : vector<8x128xf32>
    %19 = arith.mulf %18, %9 : vector<8x128xf32>
    %c1 = arith.constant 1 : index
    %c0_7 = arith.constant 0 : index
    %c0_8 = arith.constant 0 : index
    %20 = vector.load %arg2[%c1, %c0_7, %c0_8] : memref<8x8x128xf32, #tpu.memory_space<vmem>>, vector<1x8x128xf32>
    %21 = vector.shape_cast %20 : vector<1x8x128xf32> to vector<8x128xf32>
    %22 = vector.shape_cast %19 : vector<8x128xf32> to vector<1x8x128xf32>
    tpu.vector_store %arg2[%c1, %c0_7, %c0_8], %22 {strides = array<i32>} : memref<8x8x128xf32, #tpu.memory_space<vmem>>, vector<1x8x128xf32>,
    %23 = arith.mulf %17, %18 : vector<8x128xf32>
    %24 = arith.subf %23, %10 : vector<8x128xf32>
    %25 = arith.mulf %24, %9 : vector<8x128xf32>
    %c2 = arith.constant 2 : index
    %c0_9 = arith.constant 0 : index
    %c0_10 = arith.constant 0 : index
    %26 = vector.load %arg2[%c2, %c0_9, %c0_10] : memref<8x8x128xf32, #tpu.memory_space<vmem>>, vector<1x8x128xf32>
    %27 = vector.shape_cast %26 : vector<1x8x128xf32> to vector<8x128xf32>
    %28 = vector.shape_cast %25 : vector<8x128xf32> to vector<1x8x128xf32>
    tpu.vector_store %arg2[%c2, %c0_9, %c0_10], %28 {strides = array<i32>} : memref<8x8x128xf32, #tpu.memory_space<vmem>>, vector<1x8x128xf32>,
    %29 = arith.mulf %17, %24 : vector<8x128xf32>
    %30 = arith.subf %29, %18 : vector<8x128xf32>
    %31 = arith.mulf %30, %9 : vector<8x128xf32>
    %c3 = arith.constant 3 : index
    %c0_11 = arith.constant 0 : index
    %c0_12 = arith.constant 0 : index
    %32 = vector.load %arg2[%c3, %c0_11, %c0_12] : memref<8x8x128xf32, #tpu.memory_space<vmem>>, vector<1x8x128xf32>
    %33 = vector.shape_cast %32 : vector<1x8x128xf32> to vector<8x128xf32>
    %34 = vector.shape_cast %31 : vector<8x128xf32> to vector<1x8x128xf32>
    tpu.vector_store %arg2[%c3, %c0_11, %c0_12], %34 {strides = array<i32>} : memref<8x8x128xf32, #tpu.memory_space<vmem>>, vector<1x8x128xf32>,
    %35 = arith.mulf %17, %30 : vector<8x128xf32>
    %36 = arith.subf %35, %24 : vector<8x128xf32>
    %37 = arith.mulf %36, %9 : vector<8x128xf32>
    %c4 = arith.constant 4 : index
    %c0_13 = arith.constant 0 : index
    %c0_14 = arith.constant 0 : index
    %38 = vector.load %arg2[%c4, %c0_13, %c0_14] : memref<8x8x128xf32, #tpu.memory_space<vmem>>, vector<1x8x128xf32>
    %39 = vector.shape_cast %38 : vector<1x8x128xf32> to vector<8x128xf32>
    %40 = vector.shape_cast %37 : vector<8x128xf32> to vector<1x8x128xf32>
    tpu.vector_store %arg2[%c4, %c0_13, %c0_14], %40 {strides = array<i32>} : memref<8x8x128xf32, #tpu.memory_space<vmem>>, vector<1x8x128xf32>,
    %41 = arith.mulf %17, %36 : vector<8x128xf32>
    %42 = arith.subf %41, %30 : vector<8x128xf32>
    %43 = arith.mulf %42, %9 : vector<8x128xf32>
    %c5 = arith.constant 5 : index
    %c0_15 = arith.constant 0 : index
    %c0_16 = arith.constant 0 : index
    %44 = vector.load %arg2[%c5, %c0_15, %c0_16] : memref<8x8x128xf32, #tpu.memory_space<vmem>>, vector<1x8x128xf32>
    %45 = vector.shape_cast %44 : vector<1x8x128xf32> to vector<8x128xf32>
    %46 = vector.shape_cast %43 : vector<8x128xf32> to vector<1x8x128xf32>
    tpu.vector_store %arg2[%c5, %c0_15, %c0_16], %46 {strides = array<i32>} : memref<8x8x128xf32, #tpu.memory_space<vmem>>, vector<1x8x128xf32>,
    %47 = arith.mulf %17, %42 : vector<8x128xf32>
    %48 = arith.subf %47, %36 : vector<8x128xf32>
    %49 = arith.mulf %48, %9 : vector<8x128xf32>
    %c6 = arith.constant 6 : index
    %c0_17 = arith.constant 0 : index
    %c0_18 = arith.constant 0 : index
    %50 = vector.load %arg2[%c6, %c0_17, %c0_18] : memref<8x8x128xf32, #tpu.memory_space<vmem>>, vector<1x8x128xf32>
    %51 = vector.shape_cast %50 : vector<1x8x128xf32> to vector<8x128xf32>
    %52 = vector.shape_cast %49 : vector<8x128xf32> to vector<1x8x128xf32>
    tpu.vector_store %arg2[%c6, %c0_17, %c0_18], %52 {strides = array<i32>} : memref<8x8x128xf32, #tpu.memory_space<vmem>>, vector<1x8x128xf32>,
    %53 = arith.mulf %17, %48 : vector<8x128xf32>
    %54 = arith.subf %53, %42 : vector<8x128xf32>
    %55 = arith.mulf %54, %9 : vector<8x128xf32>
    %c7 = arith.constant 7 : index
    %c0_19 = arith.constant 0 : index
    %c0_20 = arith.constant 0 : index
    %56 = vector.load %arg2[%c7, %c0_19, %c0_20] : memref<8x8x128xf32, #tpu.memory_space<vmem>>, vector<1x8x128xf32>
    %57 = vector.shape_cast %56 : vector<1x8x128xf32> to vector<8x128xf32>
    %58 = vector.shape_cast %55 : vector<8x128xf32> to vector<1x8x128xf32>
    tpu.vector_store %arg2[%c7, %c0_19, %c0_20], %58 {strides = array<i32>} : memref<8x8x128xf32, #tpu.memory_space<vmem>>, vector<1x8x128xf32>,
    return
  }
  func.func @transform_0(%arg0: i32) -> (i32, i32) {
    %c0_i32 = arith.constant 0 : i32
    %c0_i32_0 = arith.constant 0 : i32
    return %arg0, %c0_i32 : i32, i32
  }
  func.func @transform_1(%arg0: i32) -> (i32, i32, i32) {
    %c0_i32 = arith.constant 0 : i32
    %c0_i32_0 = arith.constant 0 : i32
    %c0_i32_1 = arith.constant 0 : i32
    return %c0_i32, %arg0, %c0_i32_0 : i32, i32, i32
  }
}

</mosaic_0001>

<bundles_post_ra>
// kernel: tpu_custom_call.1
= control target key start
LH: loop header
LB: loop body
LE: loop exit
PB: predicated region body
PF: predicated region fallthrough
CT: control target
= control target key end

     0   :  { %6 = vsyncpa [#allocation3], 0  ;;  %s438_s0 = inlined_call_operand.hbm [shape: f32[8,128], index: 0, kind: input, shape index: {}]   ;;  %s439_s1 = inlined_call_operand.hbm [shape: f32[8,8,128], index: 1, kind: output, shape index: {}]  }
   0x1   :  { %7 = vsyncpa [#allocation4], 0  ;;  %s365_s6 = smov [#allocation2]   ;;  %s317_s10 = scalar_lea.hbm %s438_s0, 128 }
   0x2   :  { %s14_s7 = sshll.u32 %s365_s6, 4  ;;  %p318_p0 = scmp.ne.s32.totalorder %s438_s0, %s317_s10  ;;  %s15_s7 = int_to_ptr.vmem [resolvable:$true] %s14_s7 }
   0x3   :  { %p321_p1 = scmp.lt.u32.totalorder %s317_s10, %s438_s0 }
   0x5   :  { %p323_p2 = pnand %p321_p1, %p318_p0 }
   0x7   :  { %326 = shalt.err (!%p323_p2)
}
   0x8   :  { %s327_s15 = scalar_lea.vmem %s15_s7, 128  ;;  %p332_p4 = scmp.lt.s32.totalorder %s15_s7, %s15_s7 }
   0x9   :  { %p328_p3 = scmp.ne.s32.totalorder %s15_s7, %s327_s15  ;;  %p333_p5 = scmp.lt.s32.totalorder %s327_s15, %s327_s15 }
   0xb   :  { %p334_p6 = por %p333_p5, %p332_p4 }
   0xd   :  { %p335_p7 = pnand %p334_p6, %p328_p3 }
   0xf   :  { %338 = shalt.err (!%p335_p7)
}
  0x10   :  { %17 = dma.hbm_to_vmem [thread:$0]  %s438_s0, 128, %s15_s7, [#allocation3]  }
  0x11   :  { %361 = dma.done.wait [#allocation3], 128  }
  0x12   :  { %362 = vsyncadd [#allocation3], 4294967168  ;;  %v397_v0 = vld [vmem:[#allocation2] sm:$0xff]  ;;  %v366_v13 = vmov 683565275   ;;  %s372_s0 = smov [#allocation5]  }
  0x13   :  { %v400_v1 = vmul.f32 0.5235988, %v397_v0  ;;  %v367_v15 = vmov 2475754826   ;;  %v368_v17 = vmov 2131351028   ;;  %311 = vrcp.f32 %v397_v0 }
  0x14   :  { %v369_v19 = vmov 2102212464   ;;  %v370_v21 = vmov 920167782   ;;  %v371_v28 = vmov 1326507024  }
  0x15   :  { %v31_v2 = vand.u32 2139095040, %v400_v1  ;;  %v28_v4 = vand.u32 2147483647, %v400_v1  ;;  %vm30_vm7 = vcmp.lt.s32.totalorder %v400_v1, 0  ;;  %vm120_vm15 = vweird.f32 %v400_v1  ;;  %s277_s18 = sshll.u32 %s372_s0, 4  ;;  %s278_s18 = int_to_ptr.vmem [resolvable:$true] %s277_s18 }
  0x16   :  { %s339_s19 = scalar_lea.vmem %s278_s18, 1024  ;;  %p344_p9 = scmp.lt.s32.totalorder %s278_s18, %s278_s18 }
  0x17   :  { %v32_v3 = vshrl.u32 %v31_v2, 23  ;;  %v35_v7 = vand.u32 8388607, %v28_v4  ;;  %vm29_vm8 = vcmp.le.f32.partialorder %v28_v4, 0.7853982  ;;  %p340_p8 = scmp.ne.s32.totalorder %s278_s18, %s339_s19  ;;  %p345_p10 = scmp.lt.s32.totalorder %s339_s19, %s339_s19 }
  0x19   :  { %v289_v5 = vadd.s32 4294967169, %v32_v3  ;;  %v36_v10 = vor.u32 8388608, %v35_v7  ;;  %p346_p11 = por %p345_p10, %p344_p9 }
  0x1b   :  { %v38_v6 = vadd.s32 1, %v289_v5  ;;  %v76_v30 = vshll.u32 %v36_v10, 8  ;;  %p347_p12 = pnand %p346_p11, %p340_p8 }
  0x1d   :  { %vm39_vm0 = vcmp.gt.s32.totalorder %v38_v6, 0 }
  0x1e   :  { %v40_v8 = vsel %vm39_vm0, %v38_v6, 0 }
  0x1f   :  { %v42_v9 = vand.u32 31, %v40_v8  ;;  %v41_v11 = vshrl.u32 %v40_v8, 5 }
  0x21   :  { %v43_v12 = vsub.s32 32, %v42_v9  ;;  %v45_v14 = vshll.u32 %v366_v13, %v42_v9  ;;  %v48_v16 = vshll.u32 %v367_v15, %v42_v9  ;;  %v51_v18 = vshll.u32 %v368_v17, %v42_v9 }
  0x22   :  { %v54_v20 = vshll.u32 %v369_v19, %v42_v9  ;;  %v57_v22 = vshll.u32 %v370_v21, %v42_v9  ;;  %vm60_vm1 = vcmp.lt.s32.totalorder %v41_v11, 1  ;;  %vm61_vm2 = vcmp.lt.s32.totalorder %v41_v11, 2 }
  0x23   :  { %v44_v23 = vshrl.u32 %v366_v13, %v43_v12  ;;  %v46_v24 = vshrl.u32 %v367_v15, %v43_v12  ;;  %v49_v25 = vshrl.u32 %v368_v17, %v43_v12  ;;  %v52_v26 = vshrl.u32 %v369_v19, %v43_v12  ;;  %v312_v19 = vpop.eup %311 }
  0x24   :  { %v55_v27 = vshrl.u32 %v370_v21, %v43_v12  ;;  %v58_v29 = vshrl.u32 %v371_v28, %v43_v12  ;;  %vm62_vm3 = vcmp.lt.s32.totalorder %v41_v11, 3  ;;  %vm63_vm4 = vcmp.lt.s32.totalorder %v41_v11, 4 }
  0x25   :  { %v47_v31 = vor.u32 %v46_v24, %v45_v14  ;;  %v50_v32 = vor.u32 %v49_v25, %v48_v16  ;;  %v53_v33 = vor.u32 %v52_v26, %v51_v18 }
  0x26   :  { %v56_v34 = vor.u32 %v55_v27, %v54_v20  ;;  %v59_v35 = vor.u32 %v58_v29, %v57_v22 }
  0x27   :  { %v64_v36 = vsel %vm60_vm1, %v44_v23, %v47_v31  ;;  %v65_v37 = vsel %vm63_vm4, %v53_v33, 2102212464  ;;  %v68_v38 = vsel %vm60_vm1, %v47_v31, %v50_v32  ;;  %v72_v39 = vsel %vm60_vm1, %v50_v32, %v53_v33 }
  0x28   :  { %v66_v40 = vsel %vm62_vm3, %v50_v32, %v65_v37  ;;  %v69_v41 = vsel %vm63_vm4, %v56_v34, 920167782  ;;  %v73_v42 = vsel %vm63_vm4, %v59_v35, 1326507024  ;;  %v24_v23 = vmul.f32 %v312_v19, %v397_v0 }
  0x29   :  { %v70_v43 = vsel %vm62_vm3, %v53_v33, %v69_v41  ;;  %v74_v44 = vsel %vm62_vm3, %v56_v34, %v73_v42  ;;  %v67_v45 = vsel %vm61_vm2, %v64_v36, %v66_v40 }
  0x2a   :  { %v71_v46 = vsel %vm61_vm2, %v68_v38, %v70_v43  ;;  %v75_v47 = vsel %vm61_vm2, %v72_v39, %v74_v44  ;;  %v83_v52 = vmul.u32 %v76_v30, %v67_v45  ;;  %v25_v25 = vsub.f32 2.0, %v24_v23 }
  0x2b   :  { %v409_v48 = vmul.u32.u64.low %v76_v30, %v75_v47  ;;  %v410_v49 = vmul.u32.u64.high %v76_v30, %v75_v47, %v409_v48  ;;  %v412_v50 = vmul.u32.u64.low %v76_v30, %v71_v46  ;;  %v413_v51 = vmul.u32.u64.high %v76_v30, %v71_v46, %v412_v50 }
  0x2c   :  { %v26_v28 = vmul.f32 %v312_v19, %v25_v25 }
  0x2d   :  { %vm85_vm5 = vc.u32 %v410_v49, %v412_v50  ;;  %v86_v53 = vadd.s32 1, %v413_v51  ;;  %v84_v2 = vadd.s32 %v412_v50, %v410_v49 }
  0x2e   :  { %v27_v32 = vmul.f32 0.57735026, %v26_v28 }
  0x2f   :  { %v87_v54 = vsel %vm85_vm5, %v86_v53, %v413_v51 }
  0x30   :  { %v88_v55 = vadd.s32 %v87_v54, %v83_v52 }
  0x32   :  { %v89_v56 = vadd.s32 536870912, %v88_v55 }
  0x34   :  { %v90_v57 = vshrl.u32 %v89_v56, 30 }
  0x36   :  { %v91_v58 = vshll.u32 %v90_v57, 30  ;;  %v114_v15 = vsub.s32 4, %v90_v57 }
  0x38   :  { %v92_v59 = vsub.s32 %v88_v55, %v91_v58  ;;  %v115_v18 = vsel %vm30_vm7, %v114_v15, %v90_v57 }
  0x39   :  { %v117_v22 = vsel %vm29_vm8, 0, %v115_v18 }
  0x3a   :  { %v94_v60 = vsub.s32 0, %v92_v59  ;;  %v121_v24 = vadd.s32 3, %v117_v22  ;;  %v227_v27 = vand.u32 3, %v117_v22 }
  0x3c   :  { %v290_v61 = vmin.u32 %v94_v60, %v92_v59  ;;  %v122_v26 = vand.u32 3, %v121_v24  ;;  %vm232_vm10 = vcmp.eq.s32.totalorder %v227_v27, 2  ;;  %vm229_vm12 = vcmp.eq.s32.totalorder %v227_v27, 0 }
  0x3d   :  { %vm228_vm14 = vcmp.lt.s32.totalorder %v227_v27, 2 }
  0x3e   :  { %v96_v62 = vclz %v290_v61  ;;  %vm127_vm9 = vcmp.eq.s32.totalorder %v122_v26, 2  ;;  %vm124_vm11 = vcmp.eq.s32.totalorder %v122_v26, 0  ;;  %vm123_vm13 = vcmp.lt.s32.totalorder %v122_v26, 2 }
  0x40   :  { %v291_v63 = vadd.s32 4294967294, %v96_v62 }
  0x42   :  { %vm292_vm6 = vcmp.lt.s32.totalorder %v291_v63, 0 }
  0x43   :  { %v99_v3 = vsel %vm292_vm6, 0, %v291_v63 }
  0x44   :  { %v100_v5 = vsub.s32 32, %v99_v3  ;;  %v101_v6 = vshll.u32 %v92_v59, %v99_v3  ;;  %v104_v7 = vsub.s32 4294967266, %v99_v3 }
  0x46   :  { %v102_v8 = vshrl.u32 %v84_v2, %v100_v5  ;;  %v105_v9 = vadd.s32 127, %v104_v7 }
  0x48   :  { %v103_v10 = vor.u32 %v102_v8, %v101_v6  ;;  %v106_v11 = vshll.u32 %v105_v9, 23 }
  0x4a   :  { %v107_v12 = vor.u32 4788187, %v106_v11  ;;  %v110_v13 = vcvt.s32.f32 %v103_v10 }
  0x4c   :  { %v108_v14 = vand.u32 2147483647, %v107_v12 }
  0x4e   :  { %v111_v16 = vmul.f32 %v110_v13, %v108_v14 }
  0x50   :  { %v112_v17 = vxor.u32 2147483648, %v111_v16 }
  0x52   :  { %v113_v20 = vsel %vm30_vm7, %v112_v17, %v111_v16 }
  0x53   :  { %v116_v21 = vsel %vm29_vm8, %v400_v1, %v113_v20 }
  0x54   :  { %313 = vcosq.f32 %v116_v21 }
  0x55   :  { %315 = vsinq.f32 %v116_v21 }
  0x5e   :  { %v314_v29 = vpop.eup %313 }
  0x5f   :  { %v316_v4 = vpop.eup %315  ;;  %v128_v30 = vxor.u32 2147483648, %v314_v29 }
  0x60   :  { %v125_v31 = vxor.u32 2147483648, %v316_v4 }
  0x61   :  { %v129_v0 = vsel %vm127_vm9, %v128_v30, %v316_v4  ;;  %v234_v33 = vsel %vm232_vm10, %v128_v30, %v316_v4 }
  0x62   :  { %v126_v34 = vsel %vm124_vm11, %v314_v29, %v125_v31  ;;  %v231_v35 = vsel %vm229_vm12, %v314_v29, %v125_v31 }
  0x63   :  { %v130_v36 = vsel %vm123_vm13, %v126_v34, %v129_v0  ;;  %v235_v37 = vsel %vm228_vm14, %v231_v35, %v234_v33 }
  0x64   :  { %v131_v38 = vsel %vm120_vm15, nan, %v130_v36  ;;  %v236_v39 = vsel %vm120_vm15, nan, %v235_v37 }
  0x65   :  { %v132_v40 = vmul.f32 %v131_v38, %v27_v32  ;;  %v237_v41 = vmul.f32 2.0, %v236_v39 }
  0x67   :  { %133 = vst [vmem:[#allocation5] sm:$0xff] %v132_v40  ;;  %v238_v42 = vmul.f32 %v237_v41, %v131_v38 }
  0x69   :  { %v239_v43 = vmul.f32 %v238_v42, %v27_v32  ;;  %v242_v44 = vmul.f32 %v238_v42, %v237_v41 }
  0x6b   :  { %241 = vst [vmem:[#allocation5 + $0x8] sm:$0xff] %v239_v43  ;;  %v243_v45 = vsub.f32 %v242_v44, %v131_v38 }
  0x6d   :  { %v244_v46 = vmul.f32 %v243_v45, %v27_v32  ;;  %v247_v47 = vmul.f32 %v243_v45, %v237_v41 }
  0x6f   :  { %246 = vst [vmem:[#allocation5 + $0x10] sm:$0xff] %v244_v46  ;;  %v248_v1 = vsub.f32 %v247_v47, %v238_v42 }
  0x71   :  { %v249_v48 = vmul.f32 %v248_v1, %v27_v32  ;;  %v252_v49 = vmul.f32 %v248_v1, %v237_v41 }
  0x73   :  { %251 = vst [vmem:[#allocation5 + $0x18] sm:$0xff] %v249_v48  ;;  %v253_v50 = vsub.f32 %v252_v49, %v243_v45 }
  0x75   :  { %v254_v51 = vmul.f32 %v253_v50, %v27_v32  ;;  %v257_v52 = vmul.f32 %v253_v50, %v237_v41 }
  0x77   :  { %256 = vst [vmem:[#allocation5 + $0x20] sm:$0xff] %v254_v51  ;;  %v258_v53 = vsub.f32 %v257_v52, %v248_v1 }
  0x79   :  { %v259_v54 = vmul.f32 %v258_v53, %v27_v32  ;;  %v262_v55 = vmul.f32 %v258_v53, %v237_v41 }
  0x7b   :  { %261 = vst [vmem:[#allocation5 + $0x28] sm:$0xff] %v259_v54  ;;  %v263_v56 = vsub.f32 %v262_v55, %v253_v50 }
  0x7d   :  { %v264_v57 = vmul.f32 %v263_v56, %v27_v32  ;;  %v267_v58 = vmul.f32 %v263_v56, %v237_v41 }
  0x7f   :  { %266 = vst [vmem:[#allocation5 + $0x30] sm:$0xff] %v264_v57  ;;  %v268_v59 = vsub.f32 %v267_v58, %v258_v53 }
  0x81   :  { %v269_v60 = vmul.f32 %v268_v59, %v27_v32 }
  0x83   :  { %271 = vst [vmem:[#allocation5 + $0x38] sm:$0xff] %v269_v60 }
  0x84   :  { %350 = shalt.err (!%p347_p12)
}
  0x85   :  { %s351_s22 = scalar_lea.hbm %s439_s1, 1024 }
  0x86   :  { %p352_p13 = scmp.ne.s32.totalorder %s439_s1, %s351_s22  ;;  %p355_p0 = scmp.lt.u32.totalorder %s351_s22, %s439_s1 }
  0x88   :  { %p357_p1 = pnand %p355_p0, %p352_p13 }
  0x8a   :  { %360 = shalt.err (!%p357_p1)
}
  0x8b   :  { %s373_s27 = smov 128   ;;  %s374_s28 = smov 8  }
  0x8c   :  { %283 = dma.vmem_to_hbm [thread:$0]  %s278_s18, 1024, %s439_s1, [#allocation4], %s373_s27, %s373_s27, %s374_s28  }
  0x8d   :  { %363 = dma.done.wait [#allocation4], 1024  }
  0x8e   :  { %364 = vsyncadd [#allocation4], 4294966272 }
  0x8f   :  { %287 = vsyncpa [#allocation3], 1 }
  0x90   :  { %288 = vsyncpa [#allocation4], 1 }

</bundles_post_ra>
